<compile_context>
chip_gen: v7x
topology: tpu7x:2x2x1
jax: 0.10.0
libtpu: 0.0.40
codegen_flags: <defaults>
</compile_context>

<pallas_src>
import functools
import math

import jax
import jax.numpy as jnp
from jax.experimental import pallas as pl
from jax.experimental.pallas import tpu as pltpu

LN_EPS = 1e-12          # BERT layer-norm epsilon
NEG_MASK = -10000.0     # HF BERT additive attention-mask value
VMEM_LIMIT = 32 * 1024 * 1024


def _gelu(x):
    # TODO(synk): HF BERT uses exact erf-GELU; tanh approximation used for robust
    # Mosaic lowering (numerically very close).
    return 0.5 * x * (1.0 + jnp.tanh(0.7978845608028654 * (x + 0.044715 * x * x * x)))


def _pick_tile(dim, preferred, align):
    """Largest tile <= preferred that divides dim and is align-multiple (or full dim)."""
    if dim <= preferred:
        return dim
    t = (preferred // align) * align
    while t >= align:
        if dim % t == 0:
            return t
        t -= align
    return dim


# ----------------------------------------------------------------------------------
# Kernel 1: tiled matmul + bias (+ optional GELU).  grid = (M/tm, N/tn, K/tk)
#   x, w are bf16 (MXU), accumulation f32, output bf16 by default.
# ----------------------------------------------------------------------------------
def _matmul_bias_kernel(x_ref, w_ref, b_ref, o_ref, acc_ref, *, act):
    @pl.when(pl.program_id(2) == 0)
    def _init():
        acc_ref[...] = jnp.zeros_like(acc_ref)

    acc_ref[...] += jnp.dot(x_ref[...].astype(jnp.bfloat16), w_ref[...],
                            preferred_element_type=jnp.float32)

    @pl.when(pl.program_id(2) == pl.num_programs(2) - 1)
    def _fin():
        y = acc_ref[...] + b_ref[...]
        if act == "gelu":
            y = _gelu(y)
        o_ref[...] = y.astype(o_ref.dtype)


def matmul_bias(x, w, b, *, act=None, out_dtype=jnp.bfloat16, tm=512, tn=512, tk=512):
    M, K = x.shape
    _, N = w.shape
    tm = _pick_tile(M, tm, 8)
    tn = _pick_tile(N, tn, 128)
    tk = _pick_tile(K, tk, 128)
    grid = (M // tm, N // tn, K // tk)
    bytes_accessed = (x.size * x.dtype.itemsize + w.size * w.dtype.itemsize
                      + b.size * b.dtype.itemsize + M * N * jnp.dtype(out_dtype).itemsize)
    return pl.pallas_call(
        functools.partial(_matmul_bias_kernel, act=act),
        grid=grid,
        in_specs=[
            pl.BlockSpec((tm, tk), lambda i, j, k: (i, k)),
            pl.BlockSpec((tk, tn), lambda i, j, k: (k, j)),
            pl.BlockSpec((1, tn), lambda i, j, k: (0, j)),
        ],
        out_specs=pl.BlockSpec((tm, tn), lambda i, j, k: (i, j)),
        out_shape=jax.ShapeDtypeStruct((M, N), out_dtype),
        scratch_shapes=[pltpu.VMEM((tm, tn), jnp.float32)],
        compiler_params=pltpu.CompilerParams(
            dimension_semantics=("parallel", "parallel", "arbitrary"),
            vmem_limit_bytes=VMEM_LIMIT),
        cost_estimate=pl.CostEstimate(
            flops=2 * M * K * N,
            transcendentals=M * N if act == "gelu" else 0,
            bytes_accessed=int(bytes_accessed)),
    )(x, w, b)


# ----------------------------------------------------------------------------------
# Kernel 2: dense + bias + residual + LayerNorm (attention output projection block)
#   x (ctx) and residual r are bf16; LN math in f32; output bf16.
# ----------------------------------------------------------------------------------
def _dense_res_ln_kernel(x_ref, w_ref, b_ref, r_ref, g_ref, beta_ref, o_ref):
    y = jnp.dot(x_ref[...].astype(jnp.bfloat16), w_ref[...],
                preferred_element_type=jnp.float32)
    y = y + b_ref[...] + r_ref[...].astype(jnp.float32)
    mu = jnp.mean(y, axis=-1, keepdims=True)
    var = jnp.mean(jnp.square(y - mu), axis=-1, keepdims=True)
    o_ref[...] = ((y - mu) * jax.lax.rsqrt(var + LN_EPS) * g_ref[...]
                  + beta_ref[...]).astype(o_ref.dtype)


def dense_res_ln(x, w, b, r, g, beta, *, tm=512):
    M, K = x.shape
    _, N = w.shape
    tm = _pick_tile(M, tm, 8)
    return pl.pallas_call(
        _dense_res_ln_kernel,
        grid=(M // tm,),
        in_specs=[
            pl.BlockSpec((tm, K), lambda i: (i, 0)),
            pl.BlockSpec((K, N), lambda i: (0, 0)),
            pl.BlockSpec((1, N), lambda i: (0, 0)),
            pl.BlockSpec((tm, N), lambda i: (i, 0)),
            pl.BlockSpec((1, N), lambda i: (0, 0)),
            pl.BlockSpec((1, N), lambda i: (0, 0)),
        ],
        out_specs=pl.BlockSpec((tm, N), lambda i: (i, 0)),
        out_shape=jax.ShapeDtypeStruct((M, N), jnp.bfloat16),
        compiler_params=pltpu.CompilerParams(
            dimension_semantics=("parallel",),
            vmem_limit_bytes=VMEM_LIMIT),
    )(x, w, b, r, g, beta)


# ----------------------------------------------------------------------------------
# Kernel 3: fused FFN sub-block: LN(GELU(x@w1+b1)@w2 + b2 + x)
#   x bf16 in / bf16 out; GELU intermediate cast to bf16 immediately.
# ----------------------------------------------------------------------------------
def _ffn_kernel(x_ref, w1_ref, b1_ref, w2_ref, b2_ref, g_ref, beta_ref, o_ref):
    x = x_ref[...]
    h = jnp.dot(x.astype(jnp.bfloat16), w1_ref[...],
                preferred_element_type=jnp.float32) + b1_ref[...]
    h = _gelu(h).astype(jnp.bfloat16)          # bf16 intermediate: half the VMEM/vreg
    y = jnp.dot(h, w2_ref[...],
                preferred_element_type=jnp.float32) + b2_ref[...] + x.astype(jnp.float32)
    mu = jnp.mean(y, axis=-1, keepdims=True)
    var = jnp.mean(jnp.square(y - mu), axis=-1, keepdims=True)
    o_ref[...] = ((y - mu) * jax.lax.rsqrt(var + LN_EPS) * g_ref[...]
                  + beta_ref[...]).astype(o_ref.dtype)


def ffn_res_ln(x, w1, b1, w2, b2, g, beta, *, tm=256):
    M, H = x.shape
    _, I = w1.shape
    tm = _pick_tile(M, tm, 8)
    bytes_accessed = (x.size * 2 + w1.size * 2 + w2.size * 2 + M * H * 2)
    return pl.pallas_call(
        _ffn_kernel,
        grid=(M // tm,),
        in_specs=[
            pl.BlockSpec((tm, H), lambda i: (i, 0)),
            pl.BlockSpec((H, I), lambda i: (0, 0)),
            pl.BlockSpec((1, I), lambda i: (0, 0)),
            pl.BlockSpec((I, H), lambda i: (0, 0)),
            pl.BlockSpec((1, H), lambda i: (0, 0)),
            pl.BlockSpec((1, H), lambda i: (0, 0)),
            pl.BlockSpec((1, H), lambda i: (0, 0)),
        ],
        out_specs=pl.BlockSpec((tm, H), lambda i: (i, 0)),
        out_shape=jax.ShapeDtypeStruct((M, H), jnp.bfloat16),
        compiler_params=pltpu.CompilerParams(
            dimension_semantics=("parallel",),
            vmem_limit_bytes=VMEM_LIMIT),
        cost_estimate=pl.CostEstimate(
            flops=4 * M * H * I, transcendentals=M * I,
            bytes_accessed=int(bytes_accessed)),
    )(x, w1, b1, w2, b2, g, beta)


# ----------------------------------------------------------------------------------
# Kernel 4: residual-free LayerNorm (embeddings); f32 math, bf16 output.
# ----------------------------------------------------------------------------------
def _ln_kernel(x_ref, g_ref, b_ref, o_ref):
    x = x_ref[...].astype(jnp.float32)
    mu = jnp.mean(x, axis=-1, keepdims=True)
    var = jnp.mean(jnp.square(x - mu), axis=-1, keepdims=True)
    o_ref[...] = ((x - mu) * jax.lax.rsqrt(var + LN_EPS) * g_ref[...]
                  + b_ref[...]).astype(o_ref.dtype)


def layernorm(x, g, b, *, tm=512, out_dtype=jnp.bfloat16):
    M, H = x.shape
    tm = _pick_tile(M, tm, 8)
    return pl.pallas_call(
        _ln_kernel,
        grid=(M // tm,),
        in_specs=[pl.BlockSpec((tm, H), lambda i: (i, 0)),
                  pl.BlockSpec((1, H), lambda i: (0, 0)),
                  pl.BlockSpec((1, H), lambda i: (0, 0))],
        out_specs=pl.BlockSpec((tm, H), lambda i: (i, 0)),
        out_shape=jax.ShapeDtypeStruct((M, H), out_dtype),
        compiler_params=pltpu.CompilerParams(
            dimension_semantics=("parallel",),
            vmem_limit_bytes=VMEM_LIMIT),
    )(x, g, b)


# ----------------------------------------------------------------------------------
# Kernel 5: flash-style attention over the fused QKV tensor.
#   qkv: [B, S, 3H] bf16 (q | k | v along last dim); head split/merge via index_maps.
#   The same qkv array is passed three times so q/k/v each get their own BlockSpec.
# ----------------------------------------------------------------------------------
def _flash_attn_kernel(q_ref, k_ref, v_ref, mask_ref, o_ref,
                       m_sc, l_sc, acc_sc, *, scale):
    ki = pl.program_id(3)

    @pl.when(ki == 0)
    def _init():
        m_sc[...] = jnp.full(m_sc.shape, -jnp.inf, m_sc.dtype)
        l_sc[...] = jnp.zeros(l_sc.shape, l_sc.dtype)
        acc_sc[...] = jnp.zeros(acc_sc.shape, acc_sc.dtype)

    q = q_ref[0] * scale               # [tq, Dh] bf16; scale folded into q (per review)
    k = k_ref[0]                       # [tkv, Dh] bf16
    v = v_ref[0]                       # [tkv, Dh] bf16
    s = jax.lax.dot_general(q, k, (((1,), (1,)), ((), ())),
                            preferred_element_type=jnp.float32)
    s = s + mask_ref[0]                # [1, tkv] additive mask, broadcast over q rows

    m_prev = m_sc[...]
    m_new = jnp.maximum(m_prev, jnp.max(s, axis=-1, keepdims=True))
    alpha = jnp.exp(m_prev - m_new)
    p = jnp.exp(s - m_new)
    l_sc[...] = alpha * l_sc[...] + jnp.sum(p, axis=-1, keepdims=True)
    acc_sc[...] = alpha * acc_sc[...] + jnp.dot(p.astype(v.dtype), v,
                                                preferred_element_type=jnp.float32)
    m_sc[...] = m_new

    @pl.when(ki == pl.num_programs(3) - 1)
    def _fin():
        o_ref[0] = (acc_sc[...] / l_sc[...]).astype(o_ref.dtype)   # exact normalize


def flash_attention(qkv, add_mask, B, S, nH, Dh, *, tq=256, tkv=512):
    """qkv: [B, S, 3*nH*Dh] bf16; add_mask: [B, 1, S] f32 additive. -> [B, S, H] bf16."""
    H = nH * Dh
    tq = _pick_tile(S, tq, 8)        # q-tile (second-to-last block dim -> 8-aligned)
    tkv = _pick_tile(S, tkv, 128)    # kv-tile is the mask's lane dim -> 128-aligned
    scale = 1.0 / math.sqrt(Dh)
    grid = (B, nH, S // tq, S // tkv)
    return pl.pallas_call(
        functools.partial(_flash_attn_kernel, scale=scale),
        grid=grid,
        in_specs=[
            pl.BlockSpec((1, tq, Dh), lambda b, h, qi, ki: (b, qi, h)),
            pl.BlockSpec((1, tkv, Dh), lambda b, h, qi, ki: (b, ki, nH + h)),
            pl.BlockSpec((1, tkv, Dh), lambda b, h, qi, ki: (b, ki, 2 * nH + h)),
            pl.BlockSpec((1, 1, tkv), lambda b, h, qi, ki: (b, 0, ki)),
        ],
        out_specs=pl.BlockSpec((1, tq, Dh), lambda b, h, qi, ki: (b, qi, h)),
        out_shape=jax.ShapeDtypeStruct((B, S, H), jnp.bfloat16),
        scratch_shapes=[
            pltpu.VMEM((tq, 1), jnp.float32),
            pltpu.VMEM((tq, 1), jnp.float32),
            pltpu.VMEM((tq, Dh), jnp.float32),
        ],
        compiler_params=pltpu.CompilerParams(
            dimension_semantics=("parallel", "parallel", "parallel", "arbitrary"),
            vmem_limit_bytes=VMEM_LIMIT),
    )(qkv, qkv, qkv, add_mask)


# ----------------------------------------------------------------------------------
# Kernel 6: classification head (tiny single call): logits -> softmax/argmax(/CE)
# ----------------------------------------------------------------------------------
def _softmax_argmax(logits):
    L = logits.shape[-1]
    m = jnp.max(logits, axis=-1, keepdims=True)
    e = jnp.exp(logits - m)
    z = jnp.sum(e, axis=-1, keepdims=True)
    probs = e / z
    iota = jax.lax.broadcasted_iota(jnp.int32, logits.shape, 1)
    pred = jnp.min(jnp.where(logits >= m, iota, L), axis=-1, keepdims=True)
    return probs, pred.astype(jnp.int32), m, z, iota


def _head_loss_kernel(x_ref, w_ref, b_ref, lab_ref, probs_ref, pred_ref, loss_ref):
    logits = jnp.dot(x_ref[...].astype(jnp.float32), w_ref[...],
                     preferred_element_type=jnp.float32) + b_ref[...]
    probs, pred, m, z, iota = _softmax_argmax(logits)
    probs_ref[...] = probs
    pred_ref[...] = pred
    logp = (logits - m) - jnp.log(z)
    onehot = (iota == lab_ref[...]).astype(jnp.float32)
    nll = -jnp.sum(onehot * logp, axis=-1, keepdims=True)        # [B,1]
    loss_ref[...] = jnp.mean(nll, axis=0, keepdims=True)         # [1,1]


def _head_nolabel_kernel(x_ref, w_ref, b_ref, probs_ref, pred_ref):
    logits = jnp.dot(x_ref[...].astype(jnp.float32), w_ref[...],
                     preferred_element_type=jnp.float32) + b_ref[...]
    probs, pred, _, _, _ = _softmax_argmax(logits)
    probs_ref[...] = probs
    pred_ref[...] = pred


def classifier_head(cls, w, b, labels2d=None):
    B = cls.shape[0]
    L = w.shape[1]
    if labels2d is not None:
        outs = (jax.ShapeDtypeStruct((B, L), jnp.float32),
                jax.ShapeDtypeStruct((B, 1), jnp.int32),
                jax.ShapeDtypeStruct((1, 1), jnp.float32))
        return pl.pallas_call(_head_loss_kernel, out_shape=outs)(cls, w, b, labels2d)
    outs = (jax.ShapeDtypeStruct((B, L), jnp.float32),
            jax.ShapeDtypeStruct((B, 1), jnp.int32))
    return pl.pallas_call(_head_nolabel_kernel, out_shape=outs)(cls, w, b)


# ----------------------------------------------------------------------------------
# parameters (deterministic synthetic init — no checkpoint load)
# ----------------------------------------------------------------------------------
CFG = dict(vocab=100, hidden=256, layers=2, heads=2, inter=512, max_pos=80,
           type_vocab=2, num_labels=3)


def init_params(key, cfg=CFG):
    H, I, L = cfg["hidden"], cfg["inter"], cfg["num_labels"]
    keys = iter(jax.random.split(key, 64))

    def w(shape, dtype=jnp.bfloat16):
        return (0.02 * jax.random.normal(next(keys), shape, jnp.float32)).astype(dtype)

    def zeros(n):
        return jnp.zeros((1, n), jnp.float32)

    def ones(n):
        return jnp.ones((1, n), jnp.float32)

    params = dict(
        cfg=cfg,
        word_emb=w((cfg["vocab"], H), jnp.float32),
        pos_emb=w((cfg["max_pos"], H), jnp.float32),
        type_emb=w((cfg["type_vocab"], H), jnp.float32),
        emb_ln_g=ones(H), emb_ln_b=zeros(H),
        ffn_w=w((H, L), jnp.float32), ffn_b=zeros(L),
        layers=[],
    )
    for _ in range(cfg["layers"]):
        params["layers"].append(dict(
            w_qkv=w((H, 3 * H)), b_qkv=zeros(3 * H),     # fused Q|K|V projection
            wo=w((H, H)), bo=zeros(H),
            ln1_g=ones(H), ln1_b=zeros(H),
            w1=w((H, I)), b1=zeros(I),
            w2=w((I, H)), b2=zeros(H),
            ln2_g=ones(H), ln2_b=zeros(H),
        ))
    return params


# ----------------------------------------------------------------------------------
# BertFT.forward
# ----------------------------------------------------------------------------------
def bert_ft_forward(params, input_ids, input_mask, labels=None, haslabel=True):
    cfg = params["cfg"]
    B, S = input_ids.shape
    H, nH = cfg["hidden"], cfg["heads"]
    Dh = H // nH

    # --- embeddings (gathers are glue) + residual-free LayerNorm kernel (bf16 out) ---
    emb = (params["word_emb"][input_ids]
           + params["pos_emb"][:S][None, :, :]
           + params["type_emb"][0][None, None, :])          # token_type_ids=None -> 0
    x = layernorm(emb.reshape(B * S, H), params["emb_ln_g"], params["emb_ln_b"])

    # additive attention mask [B, 1, S]
    add_mask = ((1.0 - input_mask.astype(jnp.float32)) * NEG_MASK)[:, None, :]

    # --- encoder layers (all activations carried in bf16) ---
    for lyr in params["layers"]:
        # fused QKV projection (bf16 out; head split handled inside attention specs)
        qkv = matmul_bias(x, lyr["w_qkv"], lyr["b_qkv"], out_dtype=jnp.bfloat16)
        ctx = flash_attention(qkv.reshape(B, S, 3 * H), add_mask, B, S, nH, Dh)
        # attention output projection + bias + residual + LayerNorm (fused)
        x = dense_res_ln(ctx.reshape(B * S, H), lyr["wo"], lyr["bo"], x,
                         lyr["ln1_g"], lyr["ln1_b"])
        # fused FFN sub-block: dense+GELU -> dense -> +residual -> LayerNorm
        x = ffn_res_ln(x, lyr["w1"], lyr["b1"], lyr["w2"], lyr["b2"],
                       lyr["ln2_g"], lyr["ln2_b"])

    # --- z0 = hidden_states[-1][:, 0, :]  (CLS token; trivial glue slice) ---
    cls = x.reshape(B, S, H)[:, 0, :]

    if haslabel:
        probs, pred, loss = classifier_head(cls, params["ffn_w"], params["ffn_b"],
                                            labels.reshape(B, 1).astype(jnp.int32))
        return {"logits": probs, "prediction": pred.reshape(B), "loss": loss[0, 0],
                "label": labels}
    probs, pred = classifier_head(cls, params["ffn_w"], params["ffn_b"], None)
    return {"logits": probs, "prediction": pred.reshape(B)}


# ----------------------------------------------------------------------------------
if __name__ == "__main__":
    key = jax.random.PRNGKey(0)
    pkey, dkey = jax.random.split(key)
    params = init_params(pkey)

    # NOTE: toy shapes — single-tile launches dominated by fixed per-step overhead;
    # benchmark tile choices at real BERT shapes (B*S>=4096, H=768, I=3072, S=512).
    B, S = 2, 8
    input_ids = jax.random.randint(jax.random.fold_in(dkey, 0), (B, S), 0, CFG["vocab"],
                                   dtype=jnp.int32)
    input_mask = jnp.ones((B, S), jnp.int32)
    labels = jax.random.randint(jax.random.fold_in(dkey, 1), (B,), 0, CFG["num_labels"],
                                dtype=jnp.int32)

    out = bert_ft_forward(params, input_ids, input_mask, labels, haslabel=True)
    out = jax.tree_util.tree_map(jax.block_until_ready, out)
    assert out["logits"].shape == (B, CFG["num_labels"])
    assert out["prediction"].shape == (B,)
    assert out["loss"].shape == ()

    out2 = bert_ft_forward(params, input_ids, input_mask, haslabel=False)
    out2 = jax.tree_util.tree_map(jax.block_until_ready, out2)
    assert out2["logits"].shape == (B, CFG["num_labels"])
    assert out2["prediction"].shape == (B,)

    print("KERNEL_OK")
</pallas_src>

<mosaic_0001>
module attributes {stable_mosaic.version = 11 : i64} {
  func.func @_ln_kernel(%arg0: i32, %arg1: memref<16x256xf32, #tpu.memory_space<vmem>>, %arg2: memref<1x256xf32, #tpu.memory_space<vmem>>, %arg3: memref<1x256xf32, #tpu.memory_space<vmem>>, %arg4: memref<16x256xbf16, #tpu.memory_space<vmem>>) attributes {dimension_semantics = [#tpu.dimension_semantics<parallel>], iteration_bounds = array<i64: 1>, scalar_prefetch = 0 : i64, scratch_operands = 0 : i64, tpu.core_type = #tpu.core_type<tc>, window_params = [{transform_indices = @transform_0, window_bounds = array<i64: 16, 256>}, {pipeline_mode = #tpu.pipeline_mode<synchronous>, transform_indices = @transform_1, window_bounds = array<i64: 1, 256>}, {pipeline_mode = #tpu.pipeline_mode<synchronous>, transform_indices = @transform_2, window_bounds = array<i64: 1, 256>}, {transform_indices = @transform_3, window_bounds = array<i64: 16, 256>}]} {
    %c0 = arith.constant 0 : index
    %c0_0 = arith.constant 0 : index
    %0 = vector.load %arg1[%c0, %c0_0] : memref<16x256xf32, #tpu.memory_space<vmem>>, vector<16x256xf32>
    %cst = arith.constant dense<0.000000e+00> : vector<16xf32>
    %1 = vector.multi_reduction <add>, %0, %cst [1] : vector<16x256xf32> to vector<16xf32>
    %2 = vector.shape_cast %1 : vector<16xf32> to vector<16x1xf32>
    %cst_1 = arith.constant 2.560000e+02 : f32
    %3 = vector.broadcast %cst_1 : f32 to vector<16x1xf32>
    %4 = arith.divf %2, %3 : vector<16x1xf32>
    %5 = vector.broadcast %4 : vector<16x1xf32> to vector<16x256xf32>
    %6 = arith.subf %0, %5 : vector<16x256xf32>
    %7 = arith.mulf %6, %6 : vector<16x256xf32>
    %cst_2 = arith.constant dense<0.000000e+00> : vector<16xf32>
    %8 = vector.multi_reduction <add>, %7, %cst_2 [1] : vector<16x256xf32> to vector<16xf32>
    %9 = vector.shape_cast %8 : vector<16xf32> to vector<16x1xf32>
    %cst_3 = arith.constant 2.560000e+02 : f32
    %10 = vector.broadcast %cst_3 : f32 to vector<16x1xf32>
    %11 = arith.divf %9, %10 : vector<16x1xf32>
    %12 = vector.broadcast %4 : vector<16x1xf32> to vector<16x256xf32>
    %13 = arith.subf %0, %12 : vector<16x256xf32>
    %cst_4 = arith.constant 9.99999996E-13 : f32
    %14 = vector.broadcast %cst_4 : f32 to vector<16x1xf32>
    %15 = arith.addf %11, %14 : vector<16x1xf32>
    %16 = math.rsqrt %15 : vector<16x1xf32>
    %17 = vector.broadcast %16 : vector<16x1xf32> to vector<16x256xf32>
    %18 = arith.mulf %13, %17 : vector<16x256xf32>
    %c0_5 = arith.constant 0 : index
    %c0_6 = arith.constant 0 : index
    %19 = vector.load %arg2[%c0_5, %c0_6] : memref<1x256xf32, #tpu.memory_space<vmem>>, vector<1x256xf32>
    %20 = vector.broadcast %19 : vector<1x256xf32> to vector<16x256xf32>
    %21 = arith.mulf %18, %20 : vector<16x256xf32>
    %c0_7 = arith.constant 0 : index
    %c0_8 = arith.constant 0 : index
    %22 = vector.load %arg3[%c0_7, %c0_8] : memref<1x256xf32, #tpu.memory_space<vmem>>, vector<1x256xf32>
    %23 = vector.broadcast %22 : vector<1x256xf32> to vector<16x256xf32>
    %24 = arith.addf %21, %23 : vector<16x256xf32>
    %25 = arith.truncf %24 : vector<16x256xf32> to vector<16x256xbf16>
    %c0_9 = arith.constant 0 : index
    %c0_10 = arith.constant 0 : index
    %26 = vector.load %arg4[%c0_9, %c0_10] : memref<16x256xbf16, #tpu.memory_space<vmem>>, vector<16x256xbf16>
    tpu.vector_store %arg4[%c0_9, %c0_10], %25 {strides = array<i32>} : memref<16x256xbf16, #tpu.memory_space<vmem>>, vector<16x256xbf16>,
    return
  }
  func.func @transform_0(%arg0: i32) -> (i32, i32) {
    %c0_i32 = arith.constant 0 : i32
    %c0_i32_0 = arith.constant 0 : i32
    return %arg0, %c0_i32 : i32, i32
  }
  func.func @transform_1(%arg0: i32) -> (i32, i32) {
    %c0_i32 = arith.constant 0 : i32
    %c0_i32_0 = arith.constant 0 : i32
    %c0_i32_1 = arith.constant 0 : i32
    return %c0_i32, %c0_i32_0 : i32, i32
  }
  func.func @transform_2(%arg0: i32) -> (i32, i32) {
    %c0_i32 = arith.constant 0 : i32
    %c0_i32_0 = arith.constant 0 : i32
    %c0_i32_1 = arith.constant 0 : i32
    return %c0_i32, %c0_i32_0 : i32, i32
  }
  func.func @transform_3(%arg0: i32) -> (i32, i32) {
    %c0_i32 = arith.constant 0 : i32
    %c0_i32_0 = arith.constant 0 : i32
    return %arg0, %c0_i32 : i32, i32
  }
}

</mosaic_0001>

<bundles_post_ra>
// kernel: tpu_custom_call.1
= control target key start
LH: loop header
LB: loop body
LE: loop exit
PB: predicated region body
PF: predicated region fallthrough
CT: control target
= control target key end

     0   :  { %8 = vsyncpa [#allocation3], 0  ;;  %s247_s0 = inlined_call_operand.hbm [shape: f32[16,256], index: 0, kind: input, shape index: {}]   ;;  %s248_s1 = inlined_call_operand.vmem [shape: f32[1,256], index: 1, kind: input, shape index: {}]   ;;  %s249_s2 = inlined_call_operand.vmem [shape: f32[1,256], index: 2, kind: input, shape index: {}]   ;;  %s250_s3 = inlined_call_operand.hbm [shape: bf16[16,256], index: 3, kind: output, shape index: {}]  }
   0x1   :  { %9 = vsyncpa [#allocation4], 0  ;;  %s191_s12 = smov [#allocation2]   ;;  %s143_s16 = scalar_lea.hbm %s247_s0, 512 }
   0x2   :  { %s15_s13 = sshll.u32 %s191_s12, 4  ;;  %p144_p0 = scmp.ne.s32.totalorder %s247_s0, %s143_s16  ;;  %s16_s13 = int_to_ptr.vmem [resolvable:$true] %s15_s13 }
   0x3   :  { %p147_p1 = scmp.lt.u32.totalorder %s143_s16, %s247_s0 }
   0x5   :  { %p149_p2 = pnand %p147_p1, %p144_p0 }
   0x7   :  { %152 = shalt.err (!%p149_p2)
}
   0x8   :  { %s153_s21 = scalar_lea.vmem %s16_s13, 512  ;;  %p158_p4 = scmp.lt.s32.totalorder %s16_s13, %s16_s13 }
   0x9   :  { %p154_p3 = scmp.ne.s32.totalorder %s16_s13, %s153_s21  ;;  %p159_p5 = scmp.lt.s32.totalorder %s153_s21, %s153_s21 }
   0xb   :  { %p160_p6 = por %p159_p5, %p158_p4 }
   0xd   :  { %p161_p7 = pnand %p160_p6, %p154_p3 }
   0xf   :  { %164 = shalt.err (!%p161_p7)
}
  0x10   :  { %s192_s22 = smov 256   ;;  %s193_s23 = smov 16  }
  0x11   :  { %21 = dma.hbm_to_vmem [thread:$0]  %s247_s0, 512, %s16_s13, [#allocation3], %s192_s22, %s192_s22, %s193_s23  }
  0x12   :  { %187 = dma.done.wait [#allocation3], 512  }
  0x13   :  { %188 = vsyncadd [#allocation3], 4294966784  ;;  %v29_v0 = vld [vmem:[#allocation2] sm:$0xff]  ;;  %v30_v1 = vld [vmem:[#allocation2 + $0x8] sm:$0xff]  ;;  %v68_v22 = vlaneseq }
  0x14   :  { %v31_v2 = vld [vmem:[#allocation2 + $0x10] sm:$0xff]  ;;  %v33_v3 = vadd.f32 %v30_v1, %v29_v0  ;;  %v32_v4 = vld [vmem:[#allocation2 + $0x18] sm:$0xff]  ;;  %v66_v30 = vld [vmem:[%s248_s1] sm:$0x3]  ;;  %s194_s1 = smov [#allocation5]  }
  0x15   :  { %v36_v5 = vadd.f32 %v32_v4, %v31_v2  ;;  %v69_v26 = vshrl.u32 %v68_v22, 7  ;;  %v82_v31 = vld [vmem:[%s249_s2] sm:$0x3]  ;;  %s117_s29 = sshll.u32 %s194_s1, 4  ;;  %s118_s29 = int_to_ptr.vmem [resolvable:$true] %s117_s29 }
  0x16   :  { %34 = vadd.xlane.f32.xlu0 %v33_v3  ;;  %s165_s2 = scalar_lea.vmem %s118_s29, 256  ;;  %p170_p9 = scmp.lt.s32.totalorder %s118_s29, %s118_s29 }
  0x17   :  { %v70_v28 = vsub.s32 0, %v69_v26  ;;  %v74_v29 = vsub.s32 1, %v69_v26  ;;  %p166_p8 = scmp.ne.s32.totalorder %s118_s29, %s165_s2  ;;  %p171_p10 = scmp.lt.s32.totalorder %s165_s2, %s165_s2 }
  0x19   :  { %v71_v32 = vrot.slane %v66_v30, %v70_v28  ;;  %v75_v33 = vrot.slane %v66_v30, %v74_v29  ;;  %v87_v37 = vrot.slane %v82_v31, %v70_v28  ;;  %v91_v38 = vrot.slane %v82_v31, %v74_v29  ;;  %p172_p11 = por %p171_p10, %p170_p9 }
  0x1a   :  { %37 = vadd.xlane.f32.xlu0 %v36_v5 }
  0x1b   :  { %p173_p12 = pnand %p172_p11, %p166_p8 }
  0xa3   :  { %v35_v6 = vpop.xlane.xlu0 %34 }
  0xa4   :  { %v40_v7 = vmul.f32 0.00390625, %v35_v6 }
  0xa6   :  { %v42_v8 = vsub.f32 %v29_v0, %v40_v7  ;;  %v43_v9 = vsub.f32 %v30_v1, %v40_v7 }
  0xa7   :  { %v38_v10 = vpop.xlane.xlu0 %37 }
  0xa8   :  { %v41_v11 = vmul.f32 0.00390625, %v38_v10  ;;  %v46_v12 = vmul.f32 %v42_v8, %v42_v8  ;;  %v47_v13 = vmul.f32 %v43_v9, %v43_v9 }
  0xaa   :  { %v44_v14 = vsub.f32 %v31_v2, %v41_v11  ;;  %v45_v15 = vsub.f32 %v32_v4, %v41_v11  ;;  %v50_v16 = vadd.f32 %v47_v13, %v46_v12 }
  0xac   :  { %51 = vadd.xlane.f32.xlu1 %v50_v16  ;;  %v48_v17 = vmul.f32 %v44_v14, %v44_v14  ;;  %v49_v18 = vmul.f32 %v45_v15, %v45_v15 }
  0xae   :  { %v53_v19 = vadd.f32 %v49_v18, %v48_v17 }
  0xb0   :  { %54 = vadd.xlane.f32.xlu1 %v53_v19 }
 0x139   :  { %v52_v20 = vpop.xlane.xlu1 %51 }
 0x13a   :  { %v56_v21 = vmul.f32 0.00390625, %v52_v20 }
 0x13c   :  { %v58_v23 = vadd.f32 1e-12, %v56_v21 }
 0x13d   :  { %v55_v24 = vpop.xlane.xlu1 %54 }
 0x13e   :  { %139 = vrsqrt.f32 %v58_v23  ;;  %v57_v25 = vmul.f32 0.00390625, %v55_v24 }
 0x140   :  { %v59_v27 = vadd.f32 1e-12, %v57_v25 }
 0x142   :  { %141 = vrsqrt.f32 %v59_v27 }
 0x148   :  { %v140_v34 = vpop.eup %139 }
 0x149   :  { %v62_v35 = vmul.f32 %v140_v34, %v42_v8  ;;  %v63_v36 = vmul.f32 %v140_v34, %v43_v9 }
 0x14b   :  { %v78_v39 = vmul.f32 %v71_v32, %v62_v35  ;;  %v79_v40 = vmul.f32 %v75_v33, %v63_v36 }
 0x14c   :  { %v142_v41 = vpop.eup %141 }
 0x14d   :  { %v64_v42 = vmul.f32 %v142_v41, %v44_v14  ;;  %v65_v43 = vmul.f32 %v142_v41, %v45_v15  ;;  %v94_v44 = vadd.f32 %v87_v37, %v78_v39  ;;  %v95_v45 = vadd.f32 %v91_v38, %v79_v40 }
 0x14f   :  { %v80_v46 = vmul.f32 %v71_v32, %v64_v42  ;;  %v81_v47 = vmul.f32 %v75_v33, %v65_v43  ;;  %v131_v48 = vpack.c.bf16 %v95_v45, %v94_v44 }
 0x151   :  { %v96_v49 = vadd.f32 %v87_v37, %v80_v46  ;;  %v97_v50 = vadd.f32 %v91_v38, %v81_v47  ;;  %110 = vst [vmem:[#allocation5] sm:$0xff] %v131_v48 }
 0x153   :  { %v132_v51 = vpack.c.bf16 %v97_v50, %v96_v49 }
 0x155   :  { %111 = vst [vmem:[#allocation5 + $0x8] sm:$0xff] %v132_v51 }
 0x156   :  { %176 = shalt.err (!%p173_p12)
}
 0x157   :  { %s177_s5 = scalar_lea.hbm %s250_s3, 256 }
 0x158   :  { %p178_p13 = scmp.ne.s32.totalorder %s250_s3, %s177_s5  ;;  %p181_p0 = scmp.lt.u32.totalorder %s177_s5, %s250_s3 }
 0x15a   :  { %p183_p1 = pnand %p181_p0, %p178_p13 }
 0x15c   :  { %186 = shalt.err (!%p183_p1)
}
 0x15d   :  { %s195_s10 = smov 128   ;;  %s196_s11 = smov 8  }
 0x15e   :  { %123 = dma.vmem_to_hbm [thread:$0]  %s118_s29, 256, %s250_s3, [#allocation4], %s195_s10, %s195_s10, %s196_s11  }
 0x15f   :  { %189 = dma.done.wait [#allocation4], 256  }
 0x160   :  { %190 = vsyncadd [#allocation4], 4294967040 }
 0x161   :  { %127 = vsyncpa [#allocation3], 1 }
 0x162   :  { %128 = vsyncpa [#allocation4], 1 }

</bundles_post_ra>
